<compile_context>
chip_gen: v7x
topology: tpu7x:2x2x1
jax: 0.10.0
libtpu: 0.0.40
codegen_flags: <defaults>
</compile_context>

<pallas_src>
import jax
import jax.numpy as jnp
from jax.experimental import pallas as pl
from jax.experimental.pallas import tpu as pltpu


def _round_up(x, m):
    return (x + m - 1) // m * m


def ffn_kernel(x_ref, w_ref, b_ref, o_ref):
    """One (tm, tn) output tile.

    x_ref: (tm, D)    activation tile (full feature / K dim)
    w_ref: (D, 2*tn)  fused [gate | map] weight columns for this N block
    b_ref: (1, 2*tn)  fused [gate | map] bias for this N block
    o_ref: (tm, tn)   output tile
    """
    tn = o_ref.shape[1]
    j = pl.program_id(1)

    x = x_ref[...]                                                   # (tm, D) f32
    # Single fused MXU pass producing both projections, one bias add on the slab.
    y = jnp.dot(x, w_ref[...], preferred_element_type=jnp.float32) + b_ref[...]
    gate = y[:, :tn]
    mapped = y[:, tn:]

    # Activation columns matching this output block (elementwise residual term).
    col0 = pl.multiple_of(j * tn, tn)
    x_cols = x_ref[:, pl.ds(col0, tn)]

    silu = gate * jax.nn.sigmoid(gate)                               # exp -> EUP slot
    o_ref[...] = (silu * x_cols + mapped).astype(o_ref.dtype)


def _make_spec(shape, index_map, pipeline_mode=None):
    if pipeline_mode is None:
        return pl.BlockSpec(shape, index_map)
    return pl.BlockSpec(shape, index_map, pipeline_mode=pipeline_mode)


def _choose_tiles(M, D, itemsize, tm_max=256, weight_budget_bytes=24 << 20):
    # Row tile: prefer 256 (fills the 256-wide MXU on v6e/v7x), keep multiple of 8.
    tm = min(tm_max, _round_up(M, 8))
    # N tile: keep the full fused [D, 2D] weight slab resident when it fits the
    # budget; otherwise tile output columns in 128-multiples that divide D.
    tn = D
    if D % 128 == 0 and D * 2 * D * itemsize > weight_budget_bytes:
        cand = D
        while cand > 128 and (D % cand != 0
                              or D * 2 * cand * itemsize > weight_budget_bytes):
            cand -= 128
        tn = cand
    return tm, tn


def _build_ffn_call(M_pad, D, tm, tn, dtype, weight_pipeline_mode):
    n_blocks = D // tn
    itemsize = jnp.dtype(dtype).itemsize

    # VMEM accounting: x/out double-buffered; weights per requested buffering.
    w_bufs = 1 if weight_pipeline_mode is not None else 2
    vmem_est = (D * 2 * tn * itemsize * w_bufs          # fused weights
                + 2 * tn * itemsize * w_bufs            # fused bias
                + 2 * tm * D * itemsize                 # x tiles
                + 2 * tm * tn * itemsize)               # out tiles
    vmem_limit = int(min(64 << 20, max(32 << 20, int(vmem_est * 1.5))))

    cost = pl.CostEstimate(
        flops=2 * M_pad * D * (2 * D) + 6 * M_pad * D,
        transcendentals=M_pad * D,
        bytes_accessed=itemsize * (2 * M_pad * D + 2 * D * D + 2 * D),
    )

    grid = (M_pad // tm, n_blocks)
    return pl.pallas_call(
        ffn_kernel,
        out_shape=jax.ShapeDtypeStruct((M_pad, D), dtype),
        grid_spec=pltpu.PrefetchScalarGridSpec(
            num_scalar_prefetch=0,
            grid=grid,
            in_specs=[
                pl.BlockSpec((tm, D), lambda i, j: (i, 0)),            # x tile
                _make_spec((D, 2 * tn), lambda i, j: (0, j),
                           weight_pipeline_mode),                      # fused W
                _make_spec((1, 2 * tn), lambda i, j: (0, j),
                           weight_pipeline_mode),                      # fused bias
            ],
            out_specs=pl.BlockSpec((tm, tn), lambda i, j: (i, j)),
        ),
        compiler_params=pltpu.CompilerParams(
            dimension_semantics=("parallel", "parallel"),
            vmem_limit_bytes=vmem_limit,
        ),
        cost_estimate=cost,
    )


def ffn_pallas(x, w_gate, b_gate, w_map, b_map, *, tm_max=256):
    """x: [M, D]. w_*: [D, D] in PyTorch Linear layout (y = x @ W^T + b)."""
    M, D = x.shape
    dtype = x.dtype
    itemsize = jnp.dtype(dtype).itemsize
    tm, tn = _choose_tiles(M, D, itemsize, tm_max=tm_max)
    n_blocks = D // tn
    M_pad = _round_up(M, tm)

    # Glue: pre-transpose and interleave the two projections per N block so the
    # kernel sees one lane-dense [D, 2*tn] RHS per output tile.
    # TODO(synk): for static weights, cache this fused layout across calls.
    wg_t = w_gate.T
    wm_t = w_map.T
    w_fused = jnp.concatenate(
        [wg_t.reshape(D, n_blocks, 1, tn), wm_t.reshape(D, n_blocks, 1, tn)],
        axis=2,
    ).reshape(D, 2 * D)
    b_fused = jnp.concatenate(
        [b_gate.reshape(n_blocks, 1, tn), b_map.reshape(n_blocks, 1, tn)],
        axis=1,
    ).reshape(1, 2 * D)

    x_pad = x if M_pad == M else jnp.pad(x, ((0, M_pad - M), (0, 0)))

    # Weights are resident across the row axis (constant index_map when
    # n_blocks == 1) -> request single-buffering; fall back if unsupported.
    modes = [pl.Buffered(1), None] if n_blocks == 1 else [None]
    last_err = None
    for mode in modes:
        try:
            call = _build_ffn_call(M_pad, D, tm, tn, dtype, mode)
            out = jax.block_until_ready(call(x_pad, w_fused, b_fused))
            return out[:M]
        except Exception as e:  # fall back to default pipelining
            last_err = e
    raise last_err


def ffn_ref(x, w_gate, b_gate, w_map, b_map):
    gate = x @ w_gate.T + b_gate
    return jax.nn.silu(gate) * x + (x @ w_map.T + b_map)


if __name__ == "__main__":
    key = jax.random.PRNGKey(0)
    batch, seq, input_dim = 2, 8, 128
    k_x, k_wg, k_bg, k_wm, k_bm = jax.random.split(key, 5)

    x3 = jax.random.normal(k_x, (batch, seq, input_dim), dtype=jnp.float32)
    # Deterministic synthetic Linear params (PyTorch-style shapes: W [D, D], b [D]).
    w_gate = jax.random.normal(k_wg, (input_dim, input_dim), dtype=jnp.float32) * 0.05
    b_gate = jax.random.normal(k_bg, (input_dim,), dtype=jnp.float32) * 0.05
    w_map = jax.random.normal(k_wm, (input_dim, input_dim), dtype=jnp.float32) * 0.05
    b_map = jax.random.normal(k_bm, (input_dim,), dtype=jnp.float32) * 0.05

    # Flatten leading dims into the token/row axis, run kernel, restore shape.
    x2 = x3.reshape(batch * seq, input_dim)
    out2 = ffn_pallas(x2, w_gate, b_gate, w_map, b_map)
    out = out2.reshape(batch, seq, input_dim)
    jax.block_until_ready(out)

    ref = ffn_ref(x3, w_gate, b_gate, w_map, b_map)
    assert jnp.allclose(out, ref, atol=1e-5, rtol=1e-5), "mismatch vs reference"
    print("KERNEL_OK")
</pallas_src>

<mosaic_0001>
module attributes {stable_mosaic.version = 11 : i64} {
  func.func @ffn_kernel(%arg0: i32, %arg1: i32, %arg2: memref<16x128xf32, #tpu.memory_space<vmem>>, %arg3: memref<128x256xf32, #tpu.memory_space<vmem>>, %arg4: memref<1x256xf32, #tpu.memory_space<vmem>>, %arg5: memref<16x128xf32, #tpu.memory_space<vmem>>) attributes {dimension_semantics = [#tpu.dimension_semantics<parallel>, #tpu.dimension_semantics<parallel>], iteration_bounds = array<i64: 1, 1>, scalar_prefetch = 0 : i64, scratch_operands = 0 : i64, tpu.core_type = #tpu.core_type<tc>, window_params = [{transform_indices = @transform_0, window_bounds = array<i64: 16, 128>}, {pipeline_mode = #tpu.pipeline_mode<synchronous>, transform_indices = @transform_1, window_bounds = array<i64: 128, 256>}, {pipeline_mode = #tpu.pipeline_mode<synchronous>, transform_indices = @transform_2, window_bounds = array<i64: 1, 256>}, {transform_indices = @transform_3, window_bounds = array<i64: 16, 128>}]} {
    %c0 = arith.constant 0 : index
    %c0_0 = arith.constant 0 : index
    %0 = vector.load %arg2[%c0, %c0_0] : memref<16x128xf32, #tpu.memory_space<vmem>>, vector<16x128xf32>
    %c0_1 = arith.constant 0 : index
    %c0_2 = arith.constant 0 : index
    %1 = vector.load %arg3[%c0_1, %c0_2] : memref<128x256xf32, #tpu.memory_space<vmem>>, vector<128x256xf32>
    %cst = arith.constant dense<0.000000e+00> : vector<16x256xf32>
    %2 = tpu.matmul %0, %1, %cst {dimension_numbers = #tpu.dot_dimension_numbers<[1], [0], [0], [1], [0, 0, 1, 1], [], []>} : vector<16x128xf32>, vector<128x256xf32>, vector<16x256xf32> -> vector<16x256xf32>
    %c0_3 = arith.constant 0 : index
    %c0_4 = arith.constant 0 : index
    %3 = vector.load %arg4[%c0_3, %c0_4] : memref<1x256xf32, #tpu.memory_space<vmem>>, vector<1x256xf32>
    %4 = vector.broadcast %3 : vector<1x256xf32> to vector<16x256xf32>
    %5 = arith.addf %2, %4 : vector<16x256xf32>
    %6 = vector.extract_strided_slice %5 {offsets = [0, 0], sizes = [16, 128], strides = [1, 1]} : vector<16x256xf32> to vector<16x128xf32>
    %7 = vector.extract_strided_slice %5 {offsets = [0, 128], sizes = [16, 128], strides = [1, 1]} : vector<16x256xf32> to vector<16x128xf32>
    %c128_i32 = arith.constant 128 : i32
    %8 = arith.muli %arg1, %c128_i32 : i32
    %9 = tpu.assume_multiple %8, 128 : i32
    %c0_5 = arith.constant 0 : index
    %10 = arith.index_cast %9 : i32 to index
    %11 = vector.load %arg2[%c0_5, %10] : memref<16x128xf32, #tpu.memory_space<vmem>>, vector<16x128xf32>
    %12 = arith.negf %6 : vector<16x128xf32>
    %13 = math.exp %12 : vector<16x128xf32>
    %cst_6 = arith.constant 1.000000e+00 : f32
    %14 = vector.broadcast %cst_6 : f32 to vector<16x128xf32>
    %15 = arith.addf %14, %13 : vector<16x128xf32>
    %16 = arith.divf %14, %15 : vector<16x128xf32>
    %17 = arith.mulf %6, %16 : vector<16x128xf32>
    %18 = arith.mulf %17, %11 : vector<16x128xf32>
    %19 = arith.addf %18, %7 : vector<16x128xf32>
    %c0_7 = arith.constant 0 : index
    %c0_8 = arith.constant 0 : index
    %20 = vector.load %arg5[%c0_7, %c0_8] : memref<16x128xf32, #tpu.memory_space<vmem>>, vector<16x128xf32>
    tpu.vector_store %arg5[%c0_7, %c0_8], %19 {strides = array<i32>} : memref<16x128xf32, #tpu.memory_space<vmem>>, vector<16x128xf32>,
    return
  }
  func.func @transform_0(%arg0: i32, %arg1: i32) -> (i32, i32) {
    %c0_i32 = arith.constant 0 : i32
    %c0_i32_0 = arith.constant 0 : i32
    return %arg0, %c0_i32 : i32, i32
  }
  func.func @transform_1(%arg0: i32, %arg1: i32) -> (i32, i32) {
    %c0_i32 = arith.constant 0 : i32
    %c0_i32_0 = arith.constant 0 : i32
    return %c0_i32, %arg1 : i32, i32
  }
  func.func @transform_2(%arg0: i32, %arg1: i32) -> (i32, i32) {
    %c0_i32 = arith.constant 0 : i32
    %c0_i32_0 = arith.constant 0 : i32
    return %c0_i32, %arg1 : i32, i32
  }
  func.func @transform_3(%arg0: i32, %arg1: i32) -> (i32, i32) {
    %c0_i32 = arith.constant 0 : i32
    return %arg0, %arg1 : i32, i32
  }
}

module attributes {stable_mosaic.version = 11 : i64} {
  func.func @ffn_kernel(%arg0: i32, %arg1: i32, %arg2: memref<16x128xf32, #tpu.memory_space<vmem>>, %arg3: memref<128x256xf32, #tpu.memory_space<vmem>>, %arg4: memref<1x256xf32, #tpu.memory_space<vmem>>, %arg5: memref<16x128xf32, #tpu.memory_space<vmem>>) attributes {dimension_semantics = [#tpu.dimension_semantics<parallel>, #tpu.dimension_semantics<parallel>], iteration_bounds = array<i64: 1, 1>, scalar_prefetch = 0 : i64, scratch_operands = 0 : i64, tpu.core_type = #tpu.core_type<tc>, window_params = [{transform_indices = @transform_0, window_bounds = array<i64: 16, 128>}, {transform_indices = @transform_1, window_bounds = array<i64: 128, 256>}, {transform_indices = @transform_2, window_bounds = array<i64: 1, 256>}, {transform_indices = @transform_3, window_bounds = array<i64: 16, 128>}]} {
    %c0 = arith.constant 0 : index
    %c0_0 = arith.constant 0 : index
    %0 = vector.load %arg2[%c0, %c0_0] : memref<16x128xf32, #tpu.memory_space<vmem>>, vector<16x128xf32>
    %c0_1 = arith.constant 0 : index
    %c0_2 = arith.constant 0 : index
    %1 = vector.load %arg3[%c0_1, %c0_2] : memref<128x256xf32, #tpu.memory_space<vmem>>, vector<128x256xf32>
    %cst = arith.constant dense<0.000000e+00> : vector<16x256xf32>
    %2 = tpu.matmul %0, %1, %cst {dimension_numbers = #tpu.dot_dimension_numbers<[1], [0], [0], [1], [0, 0, 1, 1], [], []>} : vector<16x128xf32>, vector<128x256xf32>, vector<16x256xf32> -> vector<16x256xf32>
    %c0_3 = arith.constant 0 : index
    %c0_4 = arith.constant 0 : index
    %3 = vector.load %arg4[%c0_3, %c0_4] : memref<1x256xf32, #tpu.memory_space<vmem>>, vector<1x256xf32>
    %4 = vector.broadcast %3 : vector<1x256xf32> to vector<16x256xf32>
    %5 = arith.addf %2, %4 : vector<16x256xf32>
    %6 = vector.extract_strided_slice %5 {offsets = [0, 0], sizes = [16, 128], strides = [1, 1]} : vector<16x256xf32> to vector<16x128xf32>
    %7 = vector.extract_strided_slice %5 {offsets = [0, 128], sizes = [16, 128], strides = [1, 1]} : vector<16x256xf32> to vector<16x128xf32>
    %c128_i32 = arith.constant 128 : i32
    %8 = arith.muli %arg1, %c128_i32 : i32
    %9 = tpu.assume_multiple %8, 128 : i32
    %c0_5 = arith.constant 0 : index
    %10 = arith.index_cast %9 : i32 to index
    %11 = vector.load %arg2[%c0_5, %10] : memref<16x128xf32, #tpu.memory_space<vmem>>, vector<16x128xf32>
    %12 = arith.negf %6 : vector<16x128xf32>
    %13 = math.exp %12 : vector<16x128xf32>
    %cst_6 = arith.constant 1.000000e+00 : f32
    %14 = vector.broadcast %cst_6 : f32 to vector<16x128xf32>
    %15 = arith.addf %14, %13 : vector<16x128xf32>
    %16 = arith.divf %14, %15 : vector<16x128xf32>
    %17 = arith.mulf %6, %16 : vector<16x128xf32>
    %18 = arith.mulf %17, %11 : vector<16x128xf32>
    %19 = arith.addf %18, %7 : vector<16x128xf32>
    %c0_7 = arith.constant 0 : index
    %c0_8 = arith.constant 0 : index
    %20 = vector.load %arg5[%c0_7, %c0_8] : memref<16x128xf32, #tpu.memory_space<vmem>>, vector<16x128xf32>
    tpu.vector_store %arg5[%c0_7, %c0_8], %19 {strides = array<i32>} : memref<16x128xf32, #tpu.memory_space<vmem>>, vector<16x128xf32>,
    return
  }
  func.func @transform_0(%arg0: i32, %arg1: i32) -> (i32, i32) {
    %c0_i32 = arith.constant 0 : i32
    %c0_i32_0 = arith.constant 0 : i32
    return %arg0, %c0_i32 : i32, i32
  }
  func.func @transform_1(%arg0: i32, %arg1: i32) -> (i32, i32) {
    %c0_i32 = arith.constant 0 : i32
    %c0_i32_0 = arith.constant 0 : i32
    return %c0_i32, %arg1 : i32, i32
  }
  func.func @transform_2(%arg0: i32, %arg1: i32) -> (i32, i32) {
    %c0_i32 = arith.constant 0 : i32
    %c0_i32_0 = arith.constant 0 : i32
    return %c0_i32, %arg1 : i32, i32
  }
  func.func @transform_3(%arg0: i32, %arg1: i32) -> (i32, i32) {
    %c0_i32 = arith.constant 0 : i32
    return %arg0, %arg1 : i32, i32
  }
}

</mosaic_0001>

<bundles_post_ra>
// kernel: tpu_custom_call.1
= control target key start
LH: loop header
LB: loop body
LE: loop exit
PB: predicated region body
PF: predicated region fallthrough
CT: control target
= control target key end

     0   :  { %8 = vsyncpa [#allocation3], 0  ;;  %s422_s0 = inlined_call_operand.hbm [shape: f32[16,128], index: 0, kind: input, shape index: {}]   ;;  %s423_s1 = inlined_call_operand.hbm [shape: f32[128,256], index: 1, kind: input, shape index: {}]   ;;  %s424_s2 = inlined_call_operand.vmem [shape: f32[1,256], index: 2, kind: input, shape index: {}]   ;;  %s425_s3 = inlined_call_operand.hbm [shape: f32[16,128], index: 3, kind: output, shape index: {}]  }
   0x1   :  { %9 = vsyncpa [#allocation6], 0 }
   0x2   :  { %10 = vsyncpa [#allocation4], 0  ;;  %s349_s12 = smov [#allocation2]   ;;  %s277_s16 = scalar_lea.hbm %s422_s0, 256 }
   0x3   :  { %s16_s13 = sshll.u32 %s349_s12, 4  ;;  %p278_p0 = scmp.ne.s32.totalorder %s422_s0, %s277_s16  ;;  %s17_s13 = int_to_ptr.vmem [resolvable:$true] %s16_s13 }
   0x4   :  { %p281_p1 = scmp.lt.u32.totalorder %s277_s16, %s422_s0 }
   0x6   :  { %p283_p2 = pnand %p281_p1, %p278_p0 }
   0x8   :  { %286 = shalt.err (!%p283_p2)
}
   0x9   :  { %s287_s21 = scalar_lea.vmem %s17_s13, 256  ;;  %p292_p4 = scmp.lt.s32.totalorder %s17_s13, %s17_s13 }
   0xa   :  { %p288_p3 = scmp.ne.s32.totalorder %s17_s13, %s287_s21  ;;  %p293_p5 = scmp.lt.s32.totalorder %s287_s21, %s287_s21 }
   0xc   :  { %p294_p6 = por %p293_p5, %p292_p4 }
   0xe   :  { %p295_p7 = pnand %p294_p6, %p288_p3 }
  0x10   :  { %298 = shalt.err (!%p295_p7)
}
  0x11   :  { %s350_s22 = smov 128   ;;  %s351_s23 = smov 8  }
  0x12   :  { %22 = dma.hbm_to_vmem [thread:$0]  %s422_s0, 256, %s17_s13, [#allocation3], %s350_s22, %s350_s22, %s351_s23  }
  0x13   :  { %s352_s26 = smov [#allocation5]   ;;  %s299_s30 = scalar_lea.hbm %s423_s1, 4096 }
  0x14   :  { %s28_s27 = sshll.u32 %s352_s26, 4  ;;  %p300_p8 = scmp.ne.s32.totalorder %s423_s1, %s299_s30  ;;  %s29_s27 = int_to_ptr.vmem [resolvable:$true] %s28_s27 }
  0x15   :  { %p303_p9 = scmp.lt.u32.totalorder %s299_s30, %s423_s1 }
  0x17   :  { %p305_p10 = pnand %p303_p9, %p300_p8 }
  0x19   :  { %308 = shalt.err (!%p305_p10)
}
  0x1a   :  { %s309_s8 = scalar_lea.vmem %s29_s27, 4096  ;;  %p314_p12 = scmp.lt.s32.totalorder %s29_s27, %s29_s27 }
  0x1b   :  { %p310_p11 = scmp.ne.s32.totalorder %s29_s27, %s309_s8  ;;  %p315_p13 = scmp.lt.s32.totalorder %s309_s8, %s309_s8 }
  0x1d   :  { %p316_p0 = por %p315_p13, %p314_p12 }
  0x1f   :  { %p317_p1 = pnand %p316_p0, %p310_p11 }
  0x21   :  { %320 = shalt.err (!%p317_p1)
}
  0x22   :  { %s353_s0 = smov 256   ;;  %s354_s9 = smov 16  }
  0x23   :  { %34 = dma.hbm_to_vmem [thread:$0]  %s423_s1, 4096, %s29_s27, [#allocation6], %s353_s0, %s353_s0, %s354_s9  }
  0x24   :  { %343 = dma.done.wait [#allocation3], 256  }
  0x25   :  { %344 = vsyncadd [#allocation3], 4294967040 }
  0x26   :  { %345 = dma.done.wait [#allocation6], 4096  }
  0x27   :  { %346 = vsyncadd [#allocation6], 4294963200  ;;  %v355_v0 = vmov 0.0   ;;  %v46_v1 = vld [vmem:[#allocation5 + $0x8] sm:$0xff]  ;;  %v48_v2 = vld [vmem:[#allocation5 + $0x18] sm:$0xff]  ;;  %v79_v51 = vlaneseq }
  0x28   :  { %153 = vmatprep.mubr.f32.mxu0 %v355_v0  ;;  %159 = vmatprep.mubr.f32.mxu1 %v355_v0  ;;  %v45_v3 = vld [vmem:[#allocation5] sm:$0xff]  ;;  %v213_v4 = vpack.c.bf16 %v48_v2, %v46_v1  ;;  %v47_v5 = vld [vmem:[#allocation5 + $0x10] sm:$0xff]  ;;  %v50_v6 = vld [vmem:[#allocation5 + $0x28] sm:$0xff] }
  0x29   :  { %v52_v7 = vld [vmem:[#allocation5 + $0x38] sm:$0xff]  ;;  %v215_v8 = vpack.c.bf16 %v47_v5, %v45_v3  ;;  %v49_v10 = vld [vmem:[#allocation5 + $0x20] sm:$0xff]  ;;  %v51_v11 = vld [vmem:[#allocation5 + $0x30] sm:$0xff]  ;;  %v80_v52 = vshrl.u32 %v79_v51, 7 }
  0x2a   :  { %v217_v9 = vpack.c.bf16 %v52_v7, %v50_v6  ;;  %v54_v12 = vld [vmem:[#allocation5 + $0x48] sm:$0xff]  ;;  %214 = vmatprep.subr.bf16.mxu0 %v213_v4  ;;  %245 = vmatprep.subr.bf16.mxu1 %v213_v4  ;;  %v56_v13 = vld [vmem:[#allocation5 + $0x58] sm:$0xff]  ;;  %v219_v14 = vpack.c.bf16 %v51_v11, %v49_v10  ;;  %v53_v16 = vld [vmem:[#allocation5 + $0x40] sm:$0xff] }
  0x2b   :  { %216 = vmatpush1.bf16.msra.mxu0 %v215_v8  ;;  %253 = vmatpush1.bf16.msra.mxu1 %v215_v8  ;;  %v221_v15 = vpack.c.bf16 %v56_v13, %v54_v12  ;;  %v55_v17 = vld [vmem:[#allocation5 + $0x50] sm:$0xff]  ;;  %v58_v18 = vld [vmem:[#allocation5 + $0x68] sm:$0xff]  ;;  %v60_v19 = vld [vmem:[#allocation5 + $0x78] sm:$0xff]  ;;  %v81_v53 = vsub.s32 0, %v80_v52  ;;  %v85_v4 = vsub.s32 1, %v80_v52 }
  0x2c   :  { %218 = vmatprep.subr.bf16.mxu0 %v217_v9  ;;  %246 = vmatprep.subr.bf16.mxu1 %v217_v9  ;;  %v223_v20 = vpack.c.bf16 %v55_v17, %v53_v16  ;;  %v225_v21 = vpack.c.bf16 %v60_v19, %v58_v18  ;;  %v57_v22 = vld [vmem:[#allocation5 + $0x60] sm:$0xff]  ;;  %v59_v23 = vld [vmem:[#allocation5 + $0x70] sm:$0xff]  ;;  %v62_v24 = vld [vmem:[#allocation5 + $0x88] sm:$0xff] }
  0x2d   :  { %v64_v25 = vld [vmem:[#allocation5 + $0x98] sm:$0xff]  ;;  %v227_v26 = vpack.c.bf16 %v59_v23, %v57_v22  ;;  %v61_v28 = vld [vmem:[#allocation5 + $0x80] sm:$0xff]  ;;  %v63_v29 = vld [vmem:[#allocation5 + $0x90] sm:$0xff] }
  0x2e   :  { %v229_v27 = vpack.c.bf16 %v64_v25, %v62_v24  ;;  %v66_v30 = vld [vmem:[#allocation5 + $0xa8] sm:$0xff]  ;;  %v68_v31 = vld [vmem:[#allocation5 + $0xb8] sm:$0xff]  ;;  %v231_v32 = vpack.c.bf16 %v63_v29, %v61_v28  ;;  %v65_v34 = vld [vmem:[#allocation5 + $0xa0] sm:$0xff] }
  0x2f   :  { %220 = vmatpush1.bf16.msra.mxu0 %v219_v14  ;;  %254 = vmatpush1.bf16.msra.mxu1 %v219_v14  ;;  %v233_v33 = vpack.c.bf16 %v68_v31, %v66_v30  ;;  %v67_v35 = vld [vmem:[#allocation5 + $0xb0] sm:$0xff]  ;;  %v70_v36 = vld [vmem:[#allocation5 + $0xc8] sm:$0xff]  ;;  %v72_v37 = vld [vmem:[#allocation5 + $0xd8] sm:$0xff] }
  0x30   :  { %222 = vmatprep.subr.bf16.mxu0 %v221_v15  ;;  %247 = vmatprep.subr.bf16.mxu1 %v221_v15  ;;  %v235_v38 = vpack.c.bf16 %v67_v35, %v65_v34  ;;  %v237_v39 = vpack.c.bf16 %v72_v37, %v70_v36  ;;  %v69_v40 = vld [vmem:[#allocation5 + $0xc0] sm:$0xff]  ;;  %v71_v41 = vld [vmem:[#allocation5 + $0xd0] sm:$0xff]  ;;  %v74_v42 = vld [vmem:[#allocation5 + $0xe8] sm:$0xff] }
  0x31   :  { %v76_v43 = vld [vmem:[#allocation5 + $0xf8] sm:$0xff]  ;;  %v239_v44 = vpack.c.bf16 %v71_v41, %v69_v40  ;;  %v73_v46 = vld [vmem:[#allocation5 + $0xe0] sm:$0xff]  ;;  %v75_v47 = vld [vmem:[#allocation5 + $0xf0] sm:$0xff] }
  0x32   :  { %v241_v45 = vpack.c.bf16 %v76_v43, %v74_v42  ;;  %v243_v48 = vpack.c.bf16 %v75_v47, %v73_v46  ;;  %v43_v49 = vld [vmem:[#allocation2] sm:$0xff]  ;;  %v44_v50 = vld [vmem:[#allocation2 + $0x8] sm:$0xff] }
  0x33   :  { %224 = vmatpush1.bf16.msra.mxu0 %v223_v20  ;;  %255 = vmatpush1.bf16.msra.mxu1 %v223_v20  ;;  %v77_v54 = vld [vmem:[%s424_s2] sm:$0x3]  ;;  %s356_s2 = smov [#allocation7]  }
  0x34   :  { %226 = vmatprep.subr.bf16.mxu0 %v225_v21  ;;  %248 = vmatprep.subr.bf16.mxu1 %v225_v21  ;;  %v82_v55 = vrot.slane %v77_v54, %v81_v53  ;;  %v86_v5 = vrot.slane %v77_v54, %v85_v4  ;;  %s197_s13 = sshll.u32 %s356_s2, 4  ;;  %s198_s13 = int_to_ptr.vmem [resolvable:$true] %s197_s13 }
  0x35   :  { %s321_s14 = scalar_lea.vmem %s198_s13, 256  ;;  %p326_p3 = scmp.lt.s32.totalorder %s198_s13, %s198_s13 }
  0x36   :  { %p322_p2 = scmp.ne.s32.totalorder %s198_s13, %s321_s14  ;;  %p327_p4 = scmp.lt.s32.totalorder %s321_s14, %s321_s14 }
  0x37   :  { %228 = vmatpush1.bf16.msra.mxu0 %v227_v26  ;;  %256 = vmatpush1.bf16.msra.mxu1 %v227_v26 }
  0x38   :  { %230 = vmatprep.subr.bf16.mxu0 %v229_v27  ;;  %249 = vmatprep.subr.bf16.mxu1 %v229_v27  ;;  %p328_p5 = por %p327_p4, %p326_p3 }
  0x3a   :  { %p329_p6 = pnand %p328_p5, %p322_p2 }
  0x3b   :  { %232 = vmatpush1.bf16.msra.mxu0 %v231_v32  ;;  %257 = vmatpush1.bf16.msra.mxu1 %v231_v32 }
  0x3c   :  { %234 = vmatprep.subr.bf16.mxu0 %v233_v33  ;;  %250 = vmatprep.subr.bf16.mxu1 %v233_v33 }
  0x3f   :  { %236 = vmatpush1.bf16.msra.mxu0 %v235_v38  ;;  %258 = vmatpush1.bf16.msra.mxu1 %v235_v38 }
  0x40   :  { %238 = vmatprep.subr.bf16.mxu0 %v237_v39  ;;  %251 = vmatprep.subr.bf16.mxu1 %v237_v39 }
  0x43   :  { %240 = vmatpush1.bf16.msra.mxu0 %v239_v44  ;;  %259 = vmatpush1.bf16.msra.mxu1 %v239_v44 }
  0x44   :  { %242 = vmatprep.subr.bf16.mxu0 %v241_v45  ;;  %252 = vmatprep.subr.bf16.mxu1 %v241_v45 }
  0x47   :  { %244 = vmatpush1.bf16.msra.mxu0 %v243_v48  ;;  %260 = vmatpush1.bf16.msra.mxu1 %v243_v48 }
  0x4a   :  { %154 = vmatmul.mubr.f32.vlgmr.msra.gmra.mrb[0].mxu0 %v43_v49  ;;  %160 = vmatmul.mubr.f32.vlgmr.msra.gmra.mrb[0].mxu1 %v44_v50 }
 0x11d   :  { %v155_v56 = vpop.f32.mrb[0].mxu0  ;;  %v161_v57 = vpop.f32.mrb[0].mxu1 }
 0x11e   :  { %v156_v58 = vadd.f32 %v155_v56, %v82_v55  ;;  %v162_v59 = vadd.f32 %v161_v57, %v82_v55  ;;  %v157_v60 = vpop.f32.mrb[1].mxu0  ;;  %v163_v61 = vpop.f32.mrb[1].mxu1 }
 0x11f   :  { %v158_v10 = vadd.f32 %v157_v60, %v86_v5  ;;  %v164_v12 = vadd.f32 %v163_v61, %v86_v5 }
 0x120   :  { %v211_v62 = vmul.f32 -1.442695, %v156_v58  ;;  %v212_v63 = vmul.f32 -1.442695, %v162_v59 }
 0x122   :  { %269 = vpow2.f32 %v211_v62 }
 0x123   :  { %271 = vpow2.f32 %v212_v63 }
 0x12c   :  { %v270_v0 = vpop.eup %269 }
 0x12d   :  { %v272_v1 = vpop.eup %271  ;;  %v178_v2 = vadd.f32 1.0, %v270_v0 }
 0x12e   :  { %v179_v3 = vadd.f32 1.0, %v272_v1 }
 0x12f   :  { %273 = vrcp.f32 %v178_v2 }
 0x130   :  { %275 = vrcp.f32 %v179_v3 }
 0x139   :  { %v274_v6 = vpop.eup %273 }
 0x13a   :  { %v276_v7 = vpop.eup %275  ;;  %v184_v8 = vmul.f32 %v274_v6, %v156_v58 }
 0x13b   :  { %v185_v9 = vmul.f32 %v276_v7, %v162_v59 }
 0x13c   :  { %v186_v11 = vmul.f32 %v184_v8, %v43_v49 }
 0x13d   :  { %v187_v13 = vmul.f32 %v185_v9, %v44_v50 }
 0x13e   :  { %v188_v14 = vadd.f32 %v186_v11, %v158_v10 }
 0x13f   :  { %v189_v15 = vadd.f32 %v187_v13, %v164_v12 }
 0x140   :  { %190 = vst [vmem:[#allocation7] sm:$0xff] %v188_v14 }
 0x141   :  { %191 = vst [vmem:[#allocation7 + $0x8] sm:$0xff] %v189_v15 }
 0x142   :  { %332 = shalt.err (!%p329_p6)
}
 0x143   :  { %s333_s17 = scalar_lea.hbm %s425_s3, 256 }
 0x144   :  { %p334_p7 = scmp.ne.s32.totalorder %s425_s3, %s333_s17  ;;  %p337_p8 = scmp.lt.u32.totalorder %s333_s17, %s425_s3 }
 0x146   :  { %p339_p9 = pnand %p337_p8, %p334_p7 }
 0x148   :  { %342 = shalt.err (!%p339_p9)
}
 0x149   :  { %203 = dma.vmem_to_hbm [thread:$0]  %s198_s13, 256, %s425_s3, [#allocation4], %s350_s22, %s350_s22, %s351_s23  }
 0x14a   :  { %347 = dma.done.wait [#allocation4], 256  }
 0x14b   :  { %348 = vsyncadd [#allocation4], 4294967040 }
 0x14c   :  { %207 = vsyncpa [#allocation3], 1 }
 0x14d   :  { %208 = vsyncpa [#allocation6], 1 }
 0x14e   :  { %209 = vsyncpa [#allocation4], 1 }

// kernel: tpu_custom_call.1
= control target key start
LH: loop header
LB: loop body
LE: loop exit
PB: predicated region body
PF: predicated region fallthrough
CT: control target
= control target key end

     0   :  { %8 = vsyncpa [#allocation3], 0  ;;  %s422_s0 = inlined_call_operand.hbm [shape: f32[16,128], index: 0, kind: input, shape index: {}]   ;;  %s423_s1 = inlined_call_operand.hbm [shape: f32[128,256], index: 1, kind: input, shape index: {}]   ;;  %s424_s2 = inlined_call_operand.vmem [shape: f32[1,256], index: 2, kind: input, shape index: {}]   ;;  %s425_s3 = inlined_call_operand.hbm [shape: f32[16,128], index: 3, kind: output, shape index: {}]  }
   0x1   :  { %9 = vsyncpa [#allocation6], 0 }
   0x2   :  { %10 = vsyncpa [#allocation4], 0  ;;  %s349_s12 = smov [#allocation2]   ;;  %s277_s16 = scalar_lea.hbm %s422_s0, 256 }
   0x3   :  { %s16_s13 = sshll.u32 %s349_s12, 4  ;;  %p278_p0 = scmp.ne.s32.totalorder %s422_s0, %s277_s16  ;;  %s17_s13 = int_to_ptr.vmem [resolvable:$true] %s16_s13 }
   0x4   :  { %p281_p1 = scmp.lt.u32.totalorder %s277_s16, %s422_s0 }
   0x6   :  { %p283_p2 = pnand %p281_p1, %p278_p0 }
   0x8   :  { %286 = shalt.err (!%p283_p2)
}
   0x9   :  { %s287_s21 = scalar_lea.vmem %s17_s13, 256  ;;  %p292_p4 = scmp.lt.s32.totalorder %s17_s13, %s17_s13 }
   0xa   :  { %p288_p3 = scmp.ne.s32.totalorder %s17_s13, %s287_s21  ;;  %p293_p5 = scmp.lt.s32.totalorder %s287_s21, %s287_s21 }
   0xc   :  { %p294_p6 = por %p293_p5, %p292_p4 }
   0xe   :  { %p295_p7 = pnand %p294_p6, %p288_p3 }
  0x10   :  { %298 = shalt.err (!%p295_p7)
}
  0x11   :  { %s350_s22 = smov 128   ;;  %s351_s23 = smov 8  }
  0x12   :  { %22 = dma.hbm_to_vmem [thread:$0]  %s422_s0, 256, %s17_s13, [#allocation3], %s350_s22, %s350_s22, %s351_s23  }
  0x13   :  { %s352_s26 = smov [#allocation5]   ;;  %s299_s30 = scalar_lea.hbm %s423_s1, 4096 }
  0x14   :  { %s28_s27 = sshll.u32 %s352_s26, 4  ;;  %p300_p8 = scmp.ne.s32.totalorder %s423_s1, %s299_s30  ;;  %s29_s27 = int_to_ptr.vmem [resolvable:$true] %s28_s27 }
  0x15   :  { %p303_p9 = scmp.lt.u32.totalorder %s299_s30, %s423_s1 }
  0x17   :  { %p305_p10 = pnand %p303_p9, %p300_p8 }
  0x19   :  { %308 = shalt.err (!%p305_p10)
}
  0x1a   :  { %s309_s8 = scalar_lea.vmem %s29_s27, 4096  ;;  %p314_p12 = scmp.lt.s32.totalorder %s29_s27, %s29_s27 }
  0x1b   :  { %p310_p11 = scmp.ne.s32.totalorder %s29_s27, %s309_s8  ;;  %p315_p13 = scmp.lt.s32.totalorder %s309_s8, %s309_s8 }
  0x1d   :  { %p316_p0 = por %p315_p13, %p314_p12 }
  0x1f   :  { %p317_p1 = pnand %p316_p0, %p310_p11 }
  0x21   :  { %320 = shalt.err (!%p317_p1)
}
  0x22   :  { %s353_s0 = smov 256   ;;  %s354_s9 = smov 16  }
  0x23   :  { %34 = dma.hbm_to_vmem [thread:$0]  %s423_s1, 4096, %s29_s27, [#allocation6], %s353_s0, %s353_s0, %s354_s9  }
  0x24   :  { %343 = dma.done.wait [#allocation3], 256  }
  0x25   :  { %344 = vsyncadd [#allocation3], 4294967040 }
  0x26   :  { %345 = dma.done.wait [#allocation6], 4096  }
  0x27   :  { %346 = vsyncadd [#allocation6], 4294963200  ;;  %v355_v0 = vmov 0.0   ;;  %v46_v1 = vld [vmem:[#allocation5 + $0x8] sm:$0xff]  ;;  %v48_v2 = vld [vmem:[#allocation5 + $0x18] sm:$0xff]  ;;  %v79_v51 = vlaneseq }
  0x28   :  { %153 = vmatprep.mubr.f32.mxu0 %v355_v0  ;;  %159 = vmatprep.mubr.f32.mxu1 %v355_v0  ;;  %v45_v3 = vld [vmem:[#allocation5] sm:$0xff]  ;;  %v213_v4 = vpack.c.bf16 %v48_v2, %v46_v1  ;;  %v47_v5 = vld [vmem:[#allocation5 + $0x10] sm:$0xff]  ;;  %v50_v6 = vld [vmem:[#allocation5 + $0x28] sm:$0xff] }
  0x29   :  { %v52_v7 = vld [vmem:[#allocation5 + $0x38] sm:$0xff]  ;;  %v215_v8 = vpack.c.bf16 %v47_v5, %v45_v3  ;;  %v49_v10 = vld [vmem:[#allocation5 + $0x20] sm:$0xff]  ;;  %v51_v11 = vld [vmem:[#allocation5 + $0x30] sm:$0xff]  ;;  %v80_v52 = vshrl.u32 %v79_v51, 7 }
  0x2a   :  { %v217_v9 = vpack.c.bf16 %v52_v7, %v50_v6  ;;  %v54_v12 = vld [vmem:[#allocation5 + $0x48] sm:$0xff]  ;;  %214 = vmatprep.subr.bf16.mxu0 %v213_v4  ;;  %245 = vmatprep.subr.bf16.mxu1 %v213_v4  ;;  %v56_v13 = vld [vmem:[#allocation5 + $0x58] sm:$0xff]  ;;  %v219_v14 = vpack.c.bf16 %v51_v11, %v49_v10  ;;  %v53_v16 = vld [vmem:[#allocation5 + $0x40] sm:$0xff] }
  0x2b   :  { %216 = vmatpush1.bf16.msra.mxu0 %v215_v8  ;;  %253 = vmatpush1.bf16.msra.mxu1 %v215_v8  ;;  %v221_v15 = vpack.c.bf16 %v56_v13, %v54_v12  ;;  %v55_v17 = vld [vmem:[#allocation5 + $0x50] sm:$0xff]  ;;  %v58_v18 = vld [vmem:[#allocation5 + $0x68] sm:$0xff]  ;;  %v60_v19 = vld [vmem:[#allocation5 + $0x78] sm:$0xff]  ;;  %v81_v53 = vsub.s32 0, %v80_v52  ;;  %v85_v4 = vsub.s32 1, %v80_v52 }
  0x2c   :  { %218 = vmatprep.subr.bf16.mxu0 %v217_v9  ;;  %246 = vmatprep.subr.bf16.mxu1 %v217_v9  ;;  %v223_v20 = vpack.c.bf16 %v55_v17, %v53_v16  ;;  %v225_v21 = vpack.c.bf16 %v60_v19, %v58_v18  ;;  %v57_v22 = vld [vmem:[#allocation5 + $0x60] sm:$0xff]  ;;  %v59_v23 = vld [vmem:[#allocation5 + $0x70] sm:$0xff]  ;;  %v62_v24 = vld [vmem:[#allocation5 + $0x88] sm:$0xff] }
  0x2d   :  { %v64_v25 = vld [vmem:[#allocation5 + $0x98] sm:$0xff]  ;;  %v227_v26 = vpack.c.bf16 %v59_v23, %v57_v22  ;;  %v61_v28 = vld [vmem:[#allocation5 + $0x80] sm:$0xff]  ;;  %v63_v29 = vld [vmem:[#allocation5 + $0x90] sm:$0xff] }
  0x2e   :  { %v229_v27 = vpack.c.bf16 %v64_v25, %v62_v24  ;;  %v66_v30 = vld [vmem:[#allocation5 + $0xa8] sm:$0xff]  ;;  %v68_v31 = vld [vmem:[#allocation5 + $0xb8] sm:$0xff]  ;;  %v231_v32 = vpack.c.bf16 %v63_v29, %v61_v28  ;;  %v65_v34 = vld [vmem:[#allocation5 + $0xa0] sm:$0xff] }
  0x2f   :  { %220 = vmatpush1.bf16.msra.mxu0 %v219_v14  ;;  %254 = vmatpush1.bf16.msra.mxu1 %v219_v14  ;;  %v233_v33 = vpack.c.bf16 %v68_v31, %v66_v30  ;;  %v67_v35 = vld [vmem:[#allocation5 + $0xb0] sm:$0xff]  ;;  %v70_v36 = vld [vmem:[#allocation5 + $0xc8] sm:$0xff]  ;;  %v72_v37 = vld [vmem:[#allocation5 + $0xd8] sm:$0xff] }
  0x30   :  { %222 = vmatprep.subr.bf16.mxu0 %v221_v15  ;;  %247 = vmatprep.subr.bf16.mxu1 %v221_v15  ;;  %v235_v38 = vpack.c.bf16 %v67_v35, %v65_v34  ;;  %v237_v39 = vpack.c.bf16 %v72_v37, %v70_v36  ;;  %v69_v40 = vld [vmem:[#allocation5 + $0xc0] sm:$0xff]  ;;  %v71_v41 = vld [vmem:[#allocation5 + $0xd0] sm:$0xff]  ;;  %v74_v42 = vld [vmem:[#allocation5 + $0xe8] sm:$0xff] }
  0x31   :  { %v76_v43 = vld [vmem:[#allocation5 + $0xf8] sm:$0xff]  ;;  %v239_v44 = vpack.c.bf16 %v71_v41, %v69_v40  ;;  %v73_v46 = vld [vmem:[#allocation5 + $0xe0] sm:$0xff]  ;;  %v75_v47 = vld [vmem:[#allocation5 + $0xf0] sm:$0xff] }
  0x32   :  { %v241_v45 = vpack.c.bf16 %v76_v43, %v74_v42  ;;  %v243_v48 = vpack.c.bf16 %v75_v47, %v73_v46  ;;  %v43_v49 = vld [vmem:[#allocation2] sm:$0xff]  ;;  %v44_v50 = vld [vmem:[#allocation2 + $0x8] sm:$0xff] }
  0x33   :  { %224 = vmatpush1.bf16.msra.mxu0 %v223_v20  ;;  %255 = vmatpush1.bf16.msra.mxu1 %v223_v20  ;;  %v77_v54 = vld [vmem:[%s424_s2] sm:$0x3]  ;;  %s356_s2 = smov [#allocation7]  }
  0x34   :  { %226 = vmatprep.subr.bf16.mxu0 %v225_v21  ;;  %248 = vmatprep.subr.bf16.mxu1 %v225_v21  ;;  %v82_v55 = vrot.slane %v77_v54, %v81_v53  ;;  %v86_v5 = vrot.slane %v77_v54, %v85_v4  ;;  %s197_s13 = sshll.u32 %s356_s2, 4  ;;  %s198_s13 = int_to_ptr.vmem [resolvable:$true] %s197_s13 }
  0x35   :  { %s321_s14 = scalar_lea.vmem %s198_s13, 256  ;;  %p326_p3 = scmp.lt.s32.totalorder %s198_s13, %s198_s13 }
  0x36   :  { %p322_p2 = scmp.ne.s32.totalorder %s198_s13, %s321_s14  ;;  %p327_p4 = scmp.lt.s32.totalorder %s321_s14, %s321_s14 }
  0x37   :  { %228 = vmatpush1.bf16.msra.mxu0 %v227_v26  ;;  %256 = vmatpush1.bf16.msra.mxu1 %v227_v26 }
  0x38   :  { %230 = vmatprep.subr.bf16.mxu0 %v229_v27  ;;  %249 = vmatprep.subr.bf16.mxu1 %v229_v27  ;;  %p328_p5 = por %p327_p4, %p326_p3 }
  0x3a   :  { %p329_p6 = pnand %p328_p5, %p322_p2 }
  0x3b   :  { %232 = vmatpush1.bf16.msra.mxu0 %v231_v32  ;;  %257 = vmatpush1.bf16.msra.mxu1 %v231_v32 }
  0x3c   :  { %234 = vmatprep.subr.bf16.mxu0 %v233_v33  ;;  %250 = vmatprep.subr.bf16.mxu1 %v233_v33 }
  0x3f   :  { %236 = vmatpush1.bf16.msra.mxu0 %v235_v38  ;;  %258 = vmatpush1.bf16.msra.mxu1 %v235_v38 }
  0x40   :  { %238 = vmatprep.subr.bf16.mxu0 %v237_v39  ;;  %251 = vmatprep.subr.bf16.mxu1 %v237_v39 }
  0x43   :  { %240 = vmatpush1.bf16.msra.mxu0 %v239_v44  ;;  %259 = vmatpush1.bf16.msra.mxu1 %v239_v44 }
  0x44   :  { %242 = vmatprep.subr.bf16.mxu0 %v241_v45  ;;  %252 = vmatprep.subr.bf16.mxu1 %v241_v45 }
  0x47   :  { %244 = vmatpush1.bf16.msra.mxu0 %v243_v48  ;;  %260 = vmatpush1.bf16.msra.mxu1 %v243_v48 }
  0x4a   :  { %154 = vmatmul.mubr.f32.vlgmr.msra.gmra.mrb[0].mxu0 %v43_v49  ;;  %160 = vmatmul.mubr.f32.vlgmr.msra.gmra.mrb[0].mxu1 %v44_v50 }
 0x11d   :  { %v155_v56 = vpop.f32.mrb[0].mxu0  ;;  %v161_v57 = vpop.f32.mrb[0].mxu1 }
 0x11e   :  { %v156_v58 = vadd.f32 %v155_v56, %v82_v55  ;;  %v162_v59 = vadd.f32 %v161_v57, %v82_v55  ;;  %v157_v60 = vpop.f32.mrb[1].mxu0  ;;  %v163_v61 = vpop.f32.mrb[1].mxu1 }
 0x11f   :  { %v158_v10 = vadd.f32 %v157_v60, %v86_v5  ;;  %v164_v12 = vadd.f32 %v163_v61, %v86_v5 }
 0x120   :  { %v211_v62 = vmul.f32 -1.442695, %v156_v58  ;;  %v212_v63 = vmul.f32 -1.442695, %v162_v59 }
 0x122   :  { %269 = vpow2.f32 %v211_v62 }
 0x123   :  { %271 = vpow2.f32 %v212_v63 }
 0x12c   :  { %v270_v0 = vpop.eup %269 }
 0x12d   :  { %v272_v1 = vpop.eup %271  ;;  %v178_v2 = vadd.f32 1.0, %v270_v0 }
 0x12e   :  { %v179_v3 = vadd.f32 1.0, %v272_v1 }
 0x12f   :  { %273 = vrcp.f32 %v178_v2 }
 0x130   :  { %275 = vrcp.f32 %v179_v3 }
 0x139   :  { %v274_v6 = vpop.eup %273 }
 0x13a   :  { %v276_v7 = vpop.eup %275  ;;  %v184_v8 = vmul.f32 %v274_v6, %v156_v58 }
 0x13b   :  { %v185_v9 = vmul.f32 %v276_v7, %v162_v59 }
 0x13c   :  { %v186_v11 = vmul.f32 %v184_v8, %v43_v49 }
 0x13d   :  { %v187_v13 = vmul.f32 %v185_v9, %v44_v50 }
 0x13e   :  { %v188_v14 = vadd.f32 %v186_v11, %v158_v10 }
 0x13f   :  { %v189_v15 = vadd.f32 %v187_v13, %v164_v12 }
 0x140   :  { %190 = vst [vmem:[#allocation7] sm:$0xff] %v188_v14 }
 0x141   :  { %191 = vst [vmem:[#allocation7 + $0x8] sm:$0xff] %v189_v15 }
 0x142   :  { %332 = shalt.err (!%p329_p6)
}
 0x143   :  { %s333_s17 = scalar_lea.hbm %s425_s3, 256 }
 0x144   :  { %p334_p7 = scmp.ne.s32.totalorder %s425_s3, %s333_s17  ;;  %p337_p8 = scmp.lt.u32.totalorder %s333_s17, %s425_s3 }
 0x146   :  { %p339_p9 = pnand %p337_p8, %p334_p7 }
 0x148   :  { %342 = shalt.err (!%p339_p9)
}
 0x149   :  { %203 = dma.vmem_to_hbm [thread:$0]  %s198_s13, 256, %s425_s3, [#allocation4], %s350_s22, %s350_s22, %s351_s23  }
 0x14a   :  { %347 = dma.done.wait [#allocation4], 256  }
 0x14b   :  { %348 = vsyncadd [#allocation4], 4294967040 }
 0x14c   :  { %207 = vsyncpa [#allocation3], 1 }
 0x14d   :  { %208 = vsyncpa [#allocation6], 1 }
 0x14e   :  { %209 = vsyncpa [#allocation4], 1 }

</bundles_post_ra>
